<compile_context>
chip_gen: v7x
topology: tpu7x:2x2x1
jax: 0.10.0
libtpu: 0.0.40
codegen_flags: <defaults>
</compile_context>

<pallas_src>
import functools
import math

import jax
import jax.numpy as jnp
from jax.experimental import pallas as pl
from jax.experimental.pallas import tpu as pltpu


def _round_up(x, m):
    return (x + m - 1) // m * m


# --------------------------------------------------------------------------
# Kernel 1: feature transform  XW = X @ W   (computed once per layer)
# --------------------------------------------------------------------------
def _feature_transform_kernel(x_ref, w_ref, o_ref):
    # x_ref: (tm, Fp) bf16, w_ref: (Fp, P) bf16 (resident), o_ref: (tm, P) bf16
    o_ref[...] = jnp.dot(
        x_ref[...], w_ref[...], preferred_element_type=jnp.float32
    ).astype(o_ref.dtype)


def _feature_transform(x, w, *, tm):
    Np, Fp = x.shape
    P = w.shape[1]
    return pl.pallas_call(
        _feature_transform_kernel,
        out_shape=jax.ShapeDtypeStruct((Np, P), jnp.bfloat16),
        grid_spec=pltpu.PrefetchScalarGridSpec(
            num_scalar_prefetch=0,
            grid=(Np // tm,),
            in_specs=[
                pl.BlockSpec((tm, Fp), lambda i: (i, 0)),   # X row-tile
                pl.BlockSpec((Fp, P), lambda i: (0, 0)),    # W (resident)
            ],
            out_specs=pl.BlockSpec((tm, P), lambda i: (i, 0)),
        ),
        compiler_params=pltpu.CompilerParams(
            dimension_semantics=("parallel",),
        ),
    )(x, w)


# --------------------------------------------------------------------------
# Kernel 2: dense propagation  out = act(A_hat @ XW + b)
#   grid = (Np // tm, Np // tk); k (last axis) is the reduction axis.
#   Only the A tile is DMA'd per grid step; XW and bias stay VMEM-resident.
# --------------------------------------------------------------------------
def _prop_kernel(a_ref, xw_ref, b_ref, o_ref, acc_ref,
                 *, tk, num_valid_cols, final_act):
    k = pl.program_id(1)

    @pl.when(k == 0)
    def _init():
        acc_ref[...] = jnp.zeros_like(acc_ref)

    # Slice the resident XW for this contraction tile (static size, aligned).
    start = pl.multiple_of(k * tk, tk)
    xw_tile = xw_ref[pl.ds(start, tk), :]
    acc_ref[...] += jnp.dot(a_ref[...], xw_tile,
                            preferred_element_type=jnp.float32)

    @pl.when(k == pl.num_programs(1) - 1)
    def _finalize():
        z = acc_ref[...] + b_ref[...]
        if final_act == "relu":
            o_ref[...] = jnp.maximum(z, 0.0).astype(o_ref.dtype)
        else:  # "log_softmax" over the real (unpadded) class columns only
            col = jax.lax.broadcasted_iota(jnp.int32, z.shape, 1)
            z = jnp.where(col < num_valid_cols, z, -jnp.inf)
            m = jnp.max(z, axis=1, keepdims=True)
            s = z - m
            lse = jnp.log(jnp.sum(jnp.exp(s), axis=1, keepdims=True))
            o_ref[...] = (s - lse).astype(o_ref.dtype)


def _propagate(a, xw, b, *, out_dtype, num_valid_cols, final_act, tm, tk):
    Np = a.shape[0]
    P = xw.shape[1]
    grid = (Np // tm, Np // tk)
    kernel = functools.partial(_prop_kernel, tk=tk,
                               num_valid_cols=num_valid_cols,
                               final_act=final_act)
    return pl.pallas_call(
        kernel,
        out_shape=jax.ShapeDtypeStruct((Np, P), out_dtype),
        grid_spec=pltpu.PrefetchScalarGridSpec(
            num_scalar_prefetch=0,
            grid=grid,
            in_specs=[
                pl.BlockSpec((tm, tk), lambda i, k: (i, k)),  # A tile (streamed)
                pl.BlockSpec((Np, P), lambda i, k: (0, 0)),   # XW (VMEM resident)
                pl.BlockSpec((1, P), lambda i, k: (0, 0)),    # bias (resident)
            ],
            out_specs=pl.BlockSpec((tm, P), lambda i, k: (i, 0)),
            scratch_shapes=[pltpu.VMEM((tm, P), jnp.float32)],
        ),
        compiler_params=pltpu.CompilerParams(
            # Row tiles are independent -> megacore-parallel; k is the
            # reduction axis (accumulator carried in VMEM scratch), kept last.
            dimension_semantics=("parallel", "arbitrary"),
            # Actual usage (2x A tile + resident XW + out + acc) is a few MiB
            # at Planetoid scale; 48 MiB is safe under v7x's 64 MiB physical
            # and leaves headroom on v5e/v6e (128 MiB).
            vmem_limit_bytes=48 * 1024 * 1024,
        ),
    )(a, xw, b)


# --------------------------------------------------------------------------
# Full 2-layer GCN forward (inference: F.dropout -> identity)
# --------------------------------------------------------------------------
def gcn_forward(a_hat, x, w1, b1, w2, b2, *, tm=512, tk=512):
    N, F = x.shape
    H = w1.shape[1]
    C = w2.shape[1]
    LANE = 128
    Fp = _round_up(F, LANE)
    Hp = _round_up(H, LANE)
    Cp = _round_up(C, LANE)
    Np = _round_up(N, math.lcm(tm, tk))

    # bf16 streams (A, X, W); f32 biases; f32 accumulation inside the kernels.
    a_p = jnp.zeros((Np, Np), jnp.bfloat16).at[:N, :N].set(
        a_hat.astype(jnp.bfloat16))
    x_p = jnp.zeros((Np, Fp), jnp.bfloat16).at[:N, :F].set(
        x.astype(jnp.bfloat16))
    w1_p = jnp.zeros((Fp, Hp), jnp.bfloat16).at[:F, :H].set(
        w1.astype(jnp.bfloat16))
    b1_p = jnp.zeros((1, Hp), jnp.float32).at[:, :H].set(
        b1.astype(jnp.float32).reshape(1, H))
    w2_p = jnp.zeros((Hp, Cp), jnp.bfloat16).at[:H, :C].set(
        w2.astype(jnp.bfloat16))
    b2_p = jnp.zeros((1, Cp), jnp.float32).at[:, :C].set(
        b2.astype(jnp.float32).reshape(1, C))

    # Layer 1: relu(A @ (X @ W1) + b1) -> lane-padded bf16 intermediate.
    xw1 = _feature_transform(x_p, w1_p, tm=tm)
    h = _propagate(a_p, xw1, b1_p, out_dtype=jnp.bfloat16,
                   num_valid_cols=H, final_act="relu", tm=tm, tk=tk)
    # F.dropout(training=False) -> identity at inference.
    # Layer 2: log_softmax(A @ (h @ W2) + b2, dim=1)
    xw2 = _feature_transform(h, w2_p, tm=tm)
    z = _propagate(a_p, xw2, b2_p, out_dtype=jnp.float32,
                   num_valid_cols=C, final_act="log_softmax", tm=tm, tk=tk)
    # TODO(synk): for graphs whose dense A_hat fits VMEM, fuse both layers in
    # one pallas_call so A_hat is read from HBM only once.
    return z[:N, :C]


def build_normalized_adjacency(edge_index, num_nodes):
    """Dense symmetric-normalized adjacency with self loops (glue, plain JAX)."""
    src, dst = edge_index[0], edge_index[1]
    adj = jnp.zeros((num_nodes, num_nodes), jnp.float32)
    adj = adj.at[src, dst].set(1.0)
    adj = adj.at[dst, src].set(1.0)                    # treat as undirected
    adj = adj + jnp.eye(num_nodes, dtype=jnp.float32)  # add self loops
    deg = jnp.sum(adj, axis=1)
    d_inv_sqrt = jnp.where(deg > 0, 1.0 / jnp.sqrt(deg), 0.0)
    return adj * d_inv_sqrt[:, None] * d_inv_sqrt[None, :]


if __name__ == "__main__":
    # Small synthetic "Planetoid-like" problem.  N=600 pads to 1024 with the
    # default 512x512 tiles, so the propagation kernel exercises a 2x2 grid
    # (multi-step accumulation + multiple row tiles).
    N = 600           # number of nodes
    F_IN = 64         # dataset.num_features
    HID = 16          # hidden size from the module
    C = 7             # dataset.num_classes (Cora-like)

    key = jax.random.PRNGKey(0)
    k_x, k_w1, k_w2 = jax.random.split(key, 3)

    # Node features (row-normalized, mimicking T.NormalizeFeatures()).
    x = jax.random.uniform(k_x, (N, F_IN), jnp.float32)
    x = x / jnp.maximum(jnp.sum(x, axis=1, keepdims=True), 1e-12)

    # Deterministic ring + chord graph.
    src = jnp.arange(N, dtype=jnp.int32)
    ring_dst = (src + 1) % N
    chord_dst = (src + 3) % N
    edge_index = jnp.stack(
        [jnp.concatenate([src, src]), jnp.concatenate([ring_dst, chord_dst])],
        axis=0)

    a_hat = build_normalized_adjacency(edge_index, N)

    # Deterministic (Glorot-style) parameter init; biases start at zero.
    w1 = jax.random.normal(k_w1, (F_IN, HID), jnp.float32) * (2.0 / (F_IN + HID)) ** 0.5
    b1 = jnp.zeros((1, HID), jnp.float32)
    w2 = jax.random.normal(k_w2, (HID, C), jnp.float32) * (2.0 / (HID + C)) ** 0.5
    b2 = jnp.zeros((1, C), jnp.float32)

    out = jax.block_until_ready(gcn_forward(a_hat, x, w1, b1, w2, b2))

    # Also exercise the small-tile multi-step path (grid 5x5 at Np=640... ->
    # actually Np=640 with tm=tk=128) to validate accumulation across k.
    out_small = jax.block_until_ready(
        gcn_forward(a_hat, x, w1, b1, w2, b2, tm=128, tk=128))

    # Pure-JAX f32 reference of the same forward pass.
    h_ref = jnp.maximum(a_hat @ (x @ w1) + b1, 0.0)
    z_ref = a_hat @ (h_ref @ w2) + b2
    ref = jax.nn.log_softmax(z_ref, axis=1)

    assert out.shape == (N, C)
    row_prob_sum = jnp.sum(jnp.exp(out), axis=1)
    assert bool(jnp.all(jnp.abs(row_prob_sum - 1.0) < 1e-3))
    assert bool(jnp.max(jnp.abs(out - ref)) < 0.1)        # bf16-stream tolerance
    assert bool(jnp.max(jnp.abs(out_small - ref)) < 0.1)  # tiling-invariance

    print("KERNEL_OK")
</pallas_src>

<mosaic_0001>
module attributes {stable_mosaic.version = 11 : i64} {
  func.func @_feature_transform_kernel(%arg0: i32, %arg1: memref<512x128xbf16, #tpu.memory_space<vmem>>, %arg2: memref<128x128xbf16, #tpu.memory_space<vmem>>, %arg3: memref<512x128xbf16, #tpu.memory_space<vmem>>) attributes {dimension_semantics = [#tpu.dimension_semantics<parallel>], iteration_bounds = array<i64: 2>, scalar_prefetch = 0 : i64, scratch_operands = 0 : i64, tpu.core_type = #tpu.core_type<tc>, window_params = [{transform_indices = @transform_0, window_bounds = array<i64: 512, 128>}, {pipeline_mode = #tpu.pipeline_mode<synchronous>, transform_indices = @transform_1, window_bounds = array<i64: 128, 128>}, {transform_indices = @transform_2, window_bounds = array<i64: 512, 128>}]} {
    %c0 = arith.constant 0 : index
    %c0_0 = arith.constant 0 : index
    %0 = vector.load %arg1[%c0, %c0_0] : memref<512x128xbf16, #tpu.memory_space<vmem>>, vector<512x128xbf16>
    %c0_1 = arith.constant 0 : index
    %c0_2 = arith.constant 0 : index
    %1 = vector.load %arg2[%c0_1, %c0_2] : memref<128x128xbf16, #tpu.memory_space<vmem>>, vector<128x128xbf16>
    %cst = arith.constant dense<0.000000e+00> : vector<512x128xf32>
    %2 = tpu.matmul %0, %1, %cst {dimension_numbers = #tpu.dot_dimension_numbers<[1], [0], [0], [1], [0, 0, 1, 1], [], []>} : vector<512x128xbf16>, vector<128x128xbf16>, vector<512x128xf32> -> vector<512x128xf32>
    %3 = arith.truncf %2 : vector<512x128xf32> to vector<512x128xbf16>
    %c0_3 = arith.constant 0 : index
    %c0_4 = arith.constant 0 : index
    %4 = vector.load %arg3[%c0_3, %c0_4] : memref<512x128xbf16, #tpu.memory_space<vmem>>, vector<512x128xbf16>
    tpu.vector_store %arg3[%c0_3, %c0_4], %3 {strides = array<i32>} : memref<512x128xbf16, #tpu.memory_space<vmem>>, vector<512x128xbf16>,
    return
  }
  func.func @transform_0(%arg0: i32) -> (i32, i32) {
    %c0_i32 = arith.constant 0 : i32
    %c0_i32_0 = arith.constant 0 : i32
    return %arg0, %c0_i32 : i32, i32
  }
  func.func @transform_1(%arg0: i32) -> (i32, i32) {
    %c0_i32 = arith.constant 0 : i32
    %c0_i32_0 = arith.constant 0 : i32
    %c0_i32_1 = arith.constant 0 : i32
    return %c0_i32, %c0_i32_0 : i32, i32
  }
  func.func @transform_2(%arg0: i32) -> (i32, i32) {
    %c0_i32 = arith.constant 0 : i32
    %c0_i32_0 = arith.constant 0 : i32
    return %arg0, %c0_i32 : i32, i32
  }
}

</mosaic_0001>

<bundles_post_ra>
// kernel: tpu_custom_call.1
= control target key start
LH: loop header
LB: loop body
LE: loop exit
PB: predicated region body
PF: predicated region fallthrough
CT: control target
= control target key end

     0   :  { %7 = vsyncpa [#allocation3], 0  ;;  %s2252_s0 = inlined_call_operand.hbm [shape: bf16[1024,128], index: 0, kind: input, shape index: {}]   ;;  %s2253_s1 = inlined_call_operand.hbm [shape: bf16[128,128], index: 1, kind: input, shape index: {}]   ;;  %s2254_s2 = inlined_call_operand.hbm [shape: bf16[1024,128], index: 2, kind: output, shape index: {}]  }
   0x1   :  { %9 = vsyncpa [#allocation3 + $0x1], 0 }
   0x2   :  { %10 = vsyncpa [#allocation6], 0 }
   0x3   :  { %11 = vsyncpa [#allocation4], 0 }
   0x4   :  { %13 = vsyncpa [#allocation4 + $0x1], 0  ;;  %s1972_s9 = smov 0   ;;  %s1974_s10 = smov 0  }
   0x5   :  { %s1976_s11 = smov 0   ;;  %s1978_s12 = smov 0  }
   0x6 LB: > { %s1993_s13 = sadd.s32 4294967295, %s1948_s12   ;;  %s1206_s14 = sadd.s32 4294967294, %s1948_s12   ;;  %s1948_s12 = sphi %s1978_s12, %s2274_s12   ;;  %s1944_s11 = sphi %s1976_s11, %s2273_s11   ;;  %s1940_s10 = sphi %s1974_s10, %s2272_s10   ;;  %s1936_s9 = sphi %s1972_s9, %s2271_s9  }
   0x7   : > { %p39_p0 = scmp.ne.s32.totalorder %s1940_s10, %s1936_s9  ;;  %p2255_p1 = scmp.eq.s32.totalorder %s1993_s13, 0 }
   0x8   : > { %p90_p3 = scmp.eq.s32.totalorder %s1206_s14, 1  ;;  %p1207_p5 = scmp.ge.s32.totalorder %s1948_s12, 1 }
   0x9   : > { %p2002_p4 = por %p2255_p1, %p39_p0  ;;  %p97_p7 = scmp.lt.s32.totalorder %s1948_s12, 3 }
   0xa   : > { %p2007_p6 = por %p90_p3, %p39_p0  ;;  %s1950_s18 = smov [#allocation5]  }
   0xb   : > { %s2258_s15 = scalar_select %p2002_p4, 1, 0 }
   0xc   : > { %s2259_s16 = scalar_select %p2007_p6, 1, 0 }
   0xd   : > { %p2012_p8 = pnand %p1207_p5, %p97_p7  ;;  %s109_s19 = sshll.u32 %s1950_s18, 4  ;;  %s2016_s19 = int_to_ptr.vmem [resolvable:$true] %s109_s19 }
   0xe   : > { %s2028_s21 = sadd.s32 1, %s1948_s12   ;;  %s26_s22 = sadd.s32 1, %s1944_s11 }
   0xf   : > { %s2260_s17 = scalar_select %p2012_p8, 1, 0 }
  0x10   : > { %p1727_p9 = pneg %p2012_p8  ;;  %s23_s23 = ssub.s32 %s1948_s12, %s2028_s21 }
  0x11   : > { %s1820_s26 = scalar_lea.hbm %s2253_s1, 1024 }
  0x12   : > { %p2023_p11 = pnand %p1727_p9, %p2255_p1  ;;  %p1821_p12 = scmp.ne.s32.totalorder %s2253_s1, %s1820_s26 }
  0x13   : > { %p1827_p5 = scmp.lt.u32.totalorder %s1820_s26, %s2253_s1 }
  0x14   : > { %p1822_p13 = pneg %p2023_p11 }
  0x16   : > { %p1823_p0 = pnand %p1822_p13, %p1821_p12 }
  0x18   : > { %p1824_p3 = pneg %p1823_p0 }
  0x1a   : > { %p1829_p7 = pnand %p1827_p5, %p1824_p3 }
  0x1c   : > { %1832 = shalt.err (!%p1829_p7)
}
  0x1d   : > { %s1833_s3 = scalar_lea.vmem %s2016_s19, 1024  ;;  %p1841_p2 = scmp.lt.s32.totalorder %s2016_s19, %s2016_s19 }
  0x1e   : > { %p1834_p9 = scmp.ne.s32.totalorder %s2016_s19, %s1833_s3  ;;  %p1842_p6 = scmp.lt.s32.totalorder %s1833_s3, %s1833_s3 }
  0x20   : > { %p1836_p10 = pnand %p1834_p9, %p1822_p13  ;;  %p1843_p4 = por %p1842_p6, %p1841_p2 }
  0x22   : > { %p1837_p1 = pneg %p1836_p10 }
  0x24   : > { %p1844_p8 = pnand %p1843_p4, %p1837_p1 }
  0x26   : > { %1847 = shalt.err (!%p1844_p8)
}
  0x27   : > { %s1951_s4 = smov 64   ;;  %s1952_s5 = smov 4  }
  0x28   : > { %1730 = dma.hbm_to_vmem [thread:$0]  (!%p2023_p11), %s2253_s1, 1024, %s2016_s19, [#allocation6], %s1951_s4, %s1951_s4, %s1952_s5  }
  0x29   : > { %p24_p1 = scmp.eq.s32.totalorder %s23_s23, 0  ;;  %p33_p2 = scmp.ne.s32.totalorder %s1944_s11, %s1940_s10 }
  0x2a   : > { %p34_p4 = scmp.eq.s32.totalorder %s1948_s12, 0  ;;  %p1740_p6 = scmp.lt.s32.totalorder %s1948_s12, 2 }
  0x2b   : > { %s2062_s8 = scalar_select %p24_p1, %s1944_s11, %s26_s22  }
  0x2c   : > { %p35_p8 = por %p34_p4, %p33_p2  ;;  %p2262_p10 = scmp.eq.s32.totalorder %s1993_s13, 1 }
  0x2d   : > { %s123_s18 = sand.u32 1, %s1944_s11   ;;  %s1326_s20 = sshll.u32 %s1948_s12, 12 }
  0x2e   : > { %p2066_p12 = por %p2262_p10, %p33_p2  ;;  %s1210_s24 = sshll.u32 %s123_s18, 8 }
  0x2f   : > { %s2075_s27 = scalar_lea.hbm %s2252_s0, %s1326_s20  ;;  %s127_s19 = scalar_lea.vmem [#allocation2], %s1210_s24 }
  0x30   : > { %s134_s22 = sshll.u32 %s127_s19, 4  ;;  %p2077_p11 = pnand %p1740_p6, %p35_p8  ;;  %s2081_s22 = int_to_ptr.vmem [resolvable:$true] %s134_s22 }
  0x31   : > { %s2083_s28 = scalar_lea.sflag [#allocation3], %s123_s18  ;;  %s1848_s29 = scalar_lea.hbm %s2075_s27, 4096 }
  0x32   : > { %p1849_p13 = scmp.ne.s32.totalorder %s2075_s27, %s1848_s29  ;;  %p1850_p0 = pneg %p2077_p11 }
  0x33   : > { %s1853_s6 = scalar_lea.hbm %s2252_s0, 8192  ;;  %p1854_p7 = scmp.lt.u32.totalorder %s2075_s27, %s2252_s0 }
  0x34   : > { %p1851_p3 = pnand %p1850_p0, %p1849_p13  ;;  %p1855_p9 = scmp.lt.u32.totalorder %s1853_s6, %s1848_s29 }
  0x35   : > { %p1857_p2 = scmp.lt.u32.totalorder %s1848_s29, %s2075_s27 }
  0x36   : > { %p1852_p5 = pneg %p1851_p3  ;;  %p1856_p1 = por %p1855_p9, %p1854_p7 }
  0x38   : > { %p1858_p4 = por %p1857_p2, %p1856_p1 }
  0x3a   : > { %p1859_p6 = pnand %p1858_p4, %p1852_p5 }
  0x3c   : > { %1862 = shalt.err (!%p1859_p6)
}
  0x3d   : > { %s1863_s18 = scalar_lea.vmem %s2081_s22, 4096  ;;  %s1953_s24 = smov [#allocation2]  }
  0x3e   : > { %p1864_p8 = scmp.ne.s32.totalorder %s2081_s22, %s1863_s18  ;;  %s1868_s25 = sshll.u32 %s1953_s24, 4  ;;  %s1869_s25 = int_to_ptr.vmem [resolvable:$false] %s1868_s25 }
  0x3f   : > { %s1870_s26 = scalar_lea.vmem %s1869_s25, 8192  ;;  %p1871_p3 = scmp.lt.s32.totalorder %s2081_s22, %s1869_s25 }
  0x40   : > { %p1866_p10 = pnand %p1864_p8, %p1850_p0  ;;  %p1872_p7 = scmp.lt.s32.totalorder %s1870_s26, %s1863_s18 }
  0x42   : > { %p1867_p13 = pneg %p1866_p10  ;;  %p1873_p9 = por %p1872_p7, %p1871_p3 }
  0x44   : > { %p1874_p1 = pnand %p1873_p9, %p1867_p13 }
  0x46   : > { %1877 = shalt.err (!%p1874_p1)
}
  0x47   : > { %1734 = dma.hbm_to_vmem [thread:$0]  (!%p2077_p11), %s2075_s27, 4096, %s2081_s22, %s2083_s28, %s1951_s4, %s1951_s4, %s1952_s5  }
  0x48   : > { %p2265_p0 = scmp.ne.s32.totalorder %s2260_s17, 0 }
  0x49   : > { %s2117_s19 = sand.u32 (!%p2265_p0), 1, %s1940_s10   ;;  %p2266_p5 = scmp.ne.s32.totalorder (!%p2265_p0), %s2258_s15, 0 }
  0x4a   : > { %146 = sbr.rel (%p2265_p0) target bundleno = 406 (0x196), region = 28  ;;  %s1214_s29 = sshll.u32 (!%p2265_p0), %s2117_s19, 8 }
  0x4b   : > { %s149_s30 = scalar_lea.sflag (!%p2265_p0), [#allocation3], %s2117_s19  ;;  %s2123_s23 = scalar_lea.vmem (!%p2265_p0), [#allocation2], %s1214_s29 }
  0x51   : > { %1923 = dma.done.wait (%p2266_p5), %s149_s30, 4096  }
  0x52   : > { %1925 = vsyncadd (%p2266_p5), %s149_s30, 4294963200  ;;  %p2267_p11 = scmp.eq.s32.totalorder %s1993_s13, 0 }
  0x54   : > { %1927 = dma.done.wait (%p2267_p11), [#allocation6], 1024   ;;  %p2268_p2 = pmov %p2267_p11 }
  0x55   : > { %v1780_v0 = vld [vmem:[#allocation5] sm:$0xff]   ;;  %v1781_v1 = vld [vmem:[#allocation5 + $0x8] sm:$0xff]   ;;  %v1782_v2 = vld [vmem:[#allocation5 + $0x10] sm:$0xff]   ;;  %s2167_s15 = scalar_lea.vmem [#allocation7], %s1214_s29  ;;  %s1391_s17 = sshll.u32 %s1993_s13, 12 }
  0x56   : > { %1929 = vsyncadd (%p2268_p2), [#allocation6], 4294966272  ;;  %1623 = vmatprep.subr.bf16.mxu0 %v1780_v0  ;;  %1703 = vmatprep.subr.bf16.mxu1 %v1780_v0  ;;  %v1783_v3 = vld [vmem:[#allocation5 + $0x18] sm:$0xff]   ;;  %v1788_v4 = vld [vmem:[%s2123_s23] sm:$0xff]   ;;  %s1123_s4 = sshll.u32 %s2167_s15, 4  ;;  %s2202_s22 = scalar_lea.hbm %s2254_s2, %s1391_s17  ;;  %s2204_s4 = int_to_ptr.vmem [resolvable:$true] %s1123_s4 }
  0x57   : > { %1624 = vmatpush3.bf16.msra.mxu0 %v1780_v0  ;;  %1711 = vmatpush3.bf16.msra.mxu1 %v1780_v0  ;;  %v1789_v5 = vld [vmem:[%s2123_s23 + $0x80] sm:$0xff]   ;;  %v1785_v7 = vld [vmem:[#allocation5 + $0x28] sm:$0xff]   ;;  %v1786_v8 = vld [vmem:[#allocation5 + $0x30] sm:$0xff]   ;;  %s1110_s13 = scalar_lea.sflag [#allocation4], %s2117_s19  ;;  %s1878_s28 = scalar_lea.vmem %s2204_s4, 4096 }
  0x58   : > { %1625 = vmatprep.subr.bf16.mxu0 %v1781_v1  ;;  %1704 = vmatprep.subr.bf16.mxu1 %v1781_v1  ;;  %v1784_v6 = vld [vmem:[#allocation5 + $0x20] sm:$0xff]   ;;  %v1787_v9 = vld [vmem:[#allocation5 + $0x38] sm:$0xff]   ;;  %v1790_v10 = vld [vmem:[%s2123_s23 + $0x8] sm:$0xff]   ;;  %p1879_p4 = scmp.ne.s32.totalorder %s2204_s4, %s1878_s28  ;;  %s1954_s3 = smov [#allocation7]  }
  0x59   : > { %1639 = vmatprep.mubr.bf16.mxu0 %v1788_v4  ;;  %1671 = vmatprep.mubr.bf16.mxu1 %v1789_v5  ;;  %v1791_v11 = vld [vmem:[%s2123_s23 + $0x88] sm:$0xff]   ;;  %v1792_v12 = vld [vmem:[%s2123_s23 + $0x10] sm:$0xff]   ;;  %v1794_v14 = vld [vmem:[%s2123_s23 + $0x18] sm:$0xff]   ;;  %s1882_s6 = sshll.u32 %s1954_s3, 4  ;;  %s1883_s6 = int_to_ptr.vmem [resolvable:$false] %s1882_s6 }
  0x5a   : > { %v1793_v13 = vld [vmem:[%s2123_s23 + $0x90] sm:$0xff]   ;;  %v1795_v15 = vld [vmem:[%s2123_s23 + $0x98] sm:$0xff]   ;;  %v1796_v16 = vld [vmem:[%s2123_s23 + $0x20] sm:$0xff]   ;;  %p1880_p6 = pnand %p1879_p4, %p2066_p12  ;;  %s1884_s7 = scalar_lea.vmem %s1883_s6, 8192 }
  0x5b   : > { %1626 = vmatpush3.bf16.msra.mxu0 %v1781_v1  ;;  %1712 = vmatpush3.bf16.msra.mxu1 %v1781_v1  ;;  %v1797_v17 = vld [vmem:[%s2123_s23 + $0xa0] sm:$0xff]   ;;  %v1798_v18 = vld [vmem:[%s2123_s23 + $0x28] sm:$0xff]   ;;  %v1800_v20 = vld [vmem:[%s2123_s23 + $0x30] sm:$0xff]   ;;  %p1885_p10 = scmp.lt.s32.totalorder %s2204_s4, %s1883_s6  ;;  %p1886_p13 = scmp.lt.s32.totalorder %s1884_s7, %s1878_s28 }
  0x5c   : > { %1627 = vmatprep.subr.bf16.mxu0 %v1782_v2  ;;  %1705 = vmatprep.subr.bf16.mxu1 %v1782_v2  ;;  %v1799_v19 = vld [vmem:[%s2123_s23 + $0xa8] sm:$0xff]   ;;  %v1801_v21 = vld [vmem:[%s2123_s23 + $0xb0] sm:$0xff]   ;;  %v1802_v22 = vld [vmem:[%s2123_s23 + $0x38] sm:$0xff]   ;;  %p1881_p8 = pneg %p1880_p6 }
  0x5d   : > { %v1803_v23 = vld [vmem:[%s2123_s23 + $0xb8] sm:$0xff]   ;;  %v1804_v24 = vld [vmem:[%s2123_s23 + $0x40] sm:$0xff]   ;;  %v1806_v26 = vld [vmem:[%s2123_s23 + $0x48] sm:$0xff]   ;;  %p1887_p3 = por %p1886_p13, %p1885_p10 }
  0x5e   : > { %v1805_v25 = vld [vmem:[%s2123_s23 + $0xc0] sm:$0xff]   ;;  %v1807_v27 = vld [vmem:[%s2123_s23 + $0xc8] sm:$0xff]   ;;  %v1808_v28 = vld [vmem:[%s2123_s23 + $0x50] sm:$0xff]  }
  0x5f   : > { %1628 = vmatpush3.bf16.msra.mxu0 %v1782_v2  ;;  %1713 = vmatpush3.bf16.msra.mxu1 %v1782_v2  ;;  %v1809_v29 = vld [vmem:[%s2123_s23 + $0xd0] sm:$0xff]   ;;  %v1810_v30 = vld [vmem:[%s2123_s23 + $0x58] sm:$0xff]   ;;  %v1812_v32 = vld [vmem:[%s2123_s23 + $0x60] sm:$0xff]   ;;  %p1888_p7 = pnand %p1887_p3, %p1881_p8 }
  0x60   : > { %1629 = vmatprep.subr.bf16.mxu0 %v1783_v3  ;;  %1706 = vmatprep.subr.bf16.mxu1 %v1783_v3  ;;  %v1811_v31 = vld [vmem:[%s2123_s23 + $0xd8] sm:$0xff]   ;;  %v1813_v33 = vld [vmem:[%s2123_s23 + $0xe0] sm:$0xff]   ;;  %v1814_v34 = vld [vmem:[%s2123_s23 + $0x68] sm:$0xff]  }
  0x61   : > { %v1815_v35 = vld [vmem:[%s2123_s23 + $0xe8] sm:$0xff]   ;;  %v1816_v36 = vld [vmem:[%s2123_s23 + $0x70] sm:$0xff]   ;;  %v1818_v38 = vld [vmem:[%s2123_s23 + $0x78] sm:$0xff]  }
  0x62   : > { %v1817_v37 = vld [vmem:[%s2123_s23 + $0xf0] sm:$0xff]   ;;  %v1819_v39 = vld [vmem:[%s2123_s23 + $0xf8] sm:$0xff]  }
  0x63   : > { %1630 = vmatpush3.bf16.msra.mxu0 %v1783_v3  ;;  %1714 = vmatpush3.bf16.msra.mxu1 %v1783_v3 }
  0x64   : > { %1631 = vmatprep.subr.bf16.mxu0 %v1784_v6  ;;  %1707 = vmatprep.subr.bf16.mxu1 %v1784_v6 }
  0x67   : > { %1632 = vmatpush3.bf16.msra.mxu0 %v1784_v6  ;;  %1715 = vmatpush3.bf16.msra.mxu1 %v1784_v6 }
  0x68   : > { %1633 = vmatprep.subr.bf16.mxu0 %v1785_v7  ;;  %1708 = vmatprep.subr.bf16.mxu1 %v1785_v7 }
  0x6b   : > { %1634 = vmatpush3.bf16.msra.mxu0 %v1785_v7  ;;  %1716 = vmatpush3.bf16.msra.mxu1 %v1785_v7 }
  0x6c   : > { %1635 = vmatprep.subr.bf16.mxu0 %v1786_v8  ;;  %1709 = vmatprep.subr.bf16.mxu1 %v1786_v8 }
  0x6f   : > { %1636 = vmatpush3.bf16.msra.mxu0 %v1786_v8  ;;  %1717 = vmatpush3.bf16.msra.mxu1 %v1786_v8 }
  0x70   : > { %1637 = vmatprep.subr.bf16.mxu0 %v1787_v9  ;;  %1710 = vmatprep.subr.bf16.mxu1 %v1787_v9 }
  0x73   : > { %1638 = vmatpush3.bf16.msra.mxu0 %v1787_v9  ;;  %1718 = vmatpush3.bf16.msra.mxu1 %v1787_v9 }
  0x76   : > { %1640 = vmatmul.mubr.bf16.vlgmr.msra.gmra.mrb[0].mxu0 %v1790_v10  ;;  %1672 = vmatmul.mubr.bf16.vlgmr.msra.gmra.mrb[0].mxu1 %v1791_v11 }
  0x77   : > { %1643 = vmatprep.mubr.bf16.mxu0 %v1792_v12  ;;  %1675 = vmatprep.mubr.bf16.mxu1 %v1793_v13 }
  0x7e   : > { %1644 = vmatmul.mubr.bf16.gmra.mrb[4].mxu0 %v1794_v14  ;;  %1676 = vmatmul.mubr.bf16.gmra.mrb[4].mxu1 %v1795_v15 }
  0x7f   : > { %1647 = vmatprep.mubr.bf16.mxu0 %v1796_v16  ;;  %1679 = vmatprep.mubr.bf16.mxu1 %v1797_v17 }
  0x86   : > { %1648 = vmatmul.mubr.bf16.gmra.mrb[8].mxu0 %v1798_v18  ;;  %1680 = vmatmul.mubr.bf16.gmra.mrb[8].mxu1 %v1799_v19 }
  0x87   : > { %1651 = vmatprep.mubr.bf16.mxu0 %v1800_v20  ;;  %1683 = vmatprep.mubr.bf16.mxu1 %v1801_v21 }
  0x8e   : > { %1652 = vmatmul.mubr.bf16.gmra.mrb[12].mxu0 %v1802_v22  ;;  %1684 = vmatmul.mubr.bf16.gmra.mrb[12].mxu1 %v1803_v23 }
  0x8f   : > { %1655 = vmatprep.mubr.bf16.mxu0 %v1804_v24  ;;  %1687 = vmatprep.mubr.bf16.mxu1 %v1805_v25 }
  0x96   : > { %1656 = vmatmul.mubr.bf16.gmra.mrb[16].mxu0 %v1806_v26  ;;  %1688 = vmatmul.mubr.bf16.gmra.mrb[16].mxu1 %v1807_v27 }
  0x97   : > { %1659 = vmatprep.mubr.bf16.mxu0 %v1808_v28  ;;  %1691 = vmatprep.mubr.bf16.mxu1 %v1809_v29 }
  0x9e   : > { %1660 = vmatmul.mubr.bf16.gmra.mrb[20].mxu0 %v1810_v30  ;;  %1692 = vmatmul.mubr.bf16.gmra.mrb[20].mxu1 %v1811_v31 }
  0x9f   : > { %1663 = vmatprep.mubr.bf16.mxu0 %v1812_v32  ;;  %1695 = vmatprep.mubr.bf16.mxu1 %v1813_v33 }
  0xa6   : > { %1664 = vmatmul.mubr.bf16.gmra.mrb[24].mxu0 %v1814_v34  ;;  %1696 = vmatmul.mubr.bf16.gmra.mrb[24].mxu1 %v1815_v35 }
  0xa7   : > { %1667 = vmatprep.mubr.bf16.mxu0 %v1816_v36  ;;  %1699 = vmatprep.mubr.bf16.mxu1 %v1817_v37 }
  0xae   : > { %1668 = vmatmul.mubr.bf16.gmra.mrb[28].mxu0 %v1818_v38  ;;  %1700 = vmatmul.mubr.bf16.gmra.mrb[28].mxu1 %v1819_v39 }
 0x149   : > { %v1641_v40 = vpop.f32.mrb[0].mxu0  ;;  %v1673_v41 = vpop.f32.mrb[0].mxu1 }
 0x14a   : > { %v534_v42 = vpop.f32.mrb[1].mxu0  ;;  %v662_v43 = vpop.f32.mrb[1].mxu1 }
 0x14b   : > { %v1642_v44 = vpop.f32.mrb[2].mxu0  ;;  %v1674_v45 = vpop.f32.mrb[2].mxu1 }
 0x14c   : > { %v1400_v46 = vpack.c.bf16 %v1642_v44, %v1641_v40  ;;  %v1480_v47 = vpack.c.bf16 %v1674_v45, %v1673_v41  ;;  %v537_v48 = vpop.f32.mrb[3].mxu0  ;;  %v665_v49 = vpop.f32.mrb[3].mxu1 }
 0x14d   : > { %v1395_v50 = vpack.c.bf16 %v537_v48, %v534_v42  ;;  %v1475_v51 = vpack.c.bf16 %v665_v49, %v662_v43 }
 0x14e   : > { %1552 = vst [vmem:[%s2167_s15 + $0x8] sm:$0xff] %v1400_v46   ;;  %1568 = vst [vmem:[%s2167_s15 + $0x88] sm:$0xff] %v1480_v47  }
 0x14f   : > { %1396 = vst [vmem:[%s2167_s15] sm:$0xff] %v1395_v50   ;;  %1567 = vst [vmem:[%s2167_s15 + $0x80] sm:$0xff] %v1475_v51  }
 0x151   : > { %v1645_v52 = vpop.f32.mrb[4].mxu0  ;;  %v1677_v53 = vpop.f32.mrb[4].mxu1 }
 0x152   : > { %v550_v54 = vpop.f32.mrb[5].mxu0  ;;  %v678_v55 = vpop.f32.mrb[5].mxu1 }
 0x153   : > { %v1646_v56 = vpop.f32.mrb[6].mxu0  ;;  %v1678_v57 = vpop.f32.mrb[6].mxu1 }
 0x154   : > { %v1410_v58 = vpack.c.bf16 %v1646_v56, %v1645_v52  ;;  %v1490_v59 = vpack.c.bf16 %v1678_v57, %v1677_v53  ;;  %v553_v60 = vpop.f32.mrb[7].mxu0  ;;  %v681_v61 = vpop.f32.mrb[7].mxu1 }
 0x155   : > { %v1405_v62 = vpack.c.bf16 %v553_v60, %v550_v54  ;;  %v1485_v63 = vpack.c.bf16 %v681_v61, %v678_v55 }
 0x156   : > { %1554 = vst [vmem:[%s2167_s15 + $0x18] sm:$0xff] %v1410_v58   ;;  %1570 = vst [vmem:[%s2167_s15 + $0x98] sm:$0xff] %v1490_v59  }
 0x157   : > { %1553 = vst [vmem:[%s2167_s15 + $0x10] sm:$0xff] %v1405_v62   ;;  %1569 = vst [vmem:[%s2167_s15 + $0x90] sm:$0xff] %v1485_v63  }
 0x159   : > { %v1649_v0 = vpop.f32.mrb[8].mxu0  ;;  %v1681_v1 = vpop.f32.mrb[8].mxu1 }
 0x15a   : > { %v566_v2 = vpop.f32.mrb[9].mxu0  ;;  %v694_v3 = vpop.f32.mrb[9].mxu1 }
 0x15b   : > { %v1650_v4 = vpop.f32.mrb[10].mxu0  ;;  %v1682_v5 = vpop.f32.mrb[10].mxu1 }
 0x15c   : > { %v1420_v6 = vpack.c.bf16 %v1650_v4, %v1649_v0  ;;  %v1500_v7 = vpack.c.bf16 %v1682_v5, %v1681_v1  ;;  %v569_v8 = vpop.f32.mrb[11].mxu0  ;;  %v697_v9 = vpop.f32.mrb[11].mxu1 }
 0x15d   : > { %v1415_v10 = vpack.c.bf16 %v569_v8, %v566_v2  ;;  %v1495_v11 = vpack.c.bf16 %v697_v9, %v694_v3 }
 0x15e   : > { %1556 = vst [vmem:[%s2167_s15 + $0x28] sm:$0xff] %v1420_v6   ;;  %1572 = vst [vmem:[%s2167_s15 + $0xa8] sm:$0xff] %v1500_v7  }
 0x15f   : > { %1555 = vst [vmem:[%s2167_s15 + $0x20] sm:$0xff] %v1415_v10   ;;  %1571 = vst [vmem:[%s2167_s15 + $0xa0] sm:$0xff] %v1495_v11  }
 0x161   : > { %v1653_v12 = vpop.f32.mrb[12].mxu0  ;;  %v1685_v13 = vpop.f32.mrb[12].mxu1 }
 0x162   : > { %v582_v14 = vpop.f32.mrb[13].mxu0  ;;  %v710_v15 = vpop.f32.mrb[13].mxu1 }
 0x163   : > { %v1654_v16 = vpop.f32.mrb[14].mxu0  ;;  %v1686_v17 = vpop.f32.mrb[14].mxu1 }
 0x164   : > { %v1430_v18 = vpack.c.bf16 %v1654_v16, %v1653_v12  ;;  %v1510_v19 = vpack.c.bf16 %v1686_v17, %v1685_v13  ;;  %v585_v20 = vpop.f32.mrb[15].mxu0  ;;  %v713_v21 = vpop.f32.mrb[15].mxu1 }
 0x165   : > { %v1425_v22 = vpack.c.bf16 %v585_v20, %v582_v14  ;;  %v1505_v23 = vpack.c.bf16 %v713_v21, %v710_v15 }
 0x166   : > { %1558 = vst [vmem:[%s2167_s15 + $0x38] sm:$0xff] %v1430_v18   ;;  %1574 = vst [vmem:[%s2167_s15 + $0xb8] sm:$0xff] %v1510_v19  }
 0x167   : > { %1557 = vst [vmem:[%s2167_s15 + $0x30] sm:$0xff] %v1425_v22   ;;  %1573 = vst [vmem:[%s2167_s15 + $0xb0] sm:$0xff] %v1505_v23  }
 0x169   : > { %v1657_v24 = vpop.f32.mrb[16].mxu0  ;;  %v1689_v25 = vpop.f32.mrb[16].mxu1 }
 0x16a   : > { %v598_v26 = vpop.f32.mrb[17].mxu0  ;;  %v726_v27 = vpop.f32.mrb[17].mxu1 }
 0x16b   : > { %v1658_v28 = vpop.f32.mrb[18].mxu0  ;;  %v1690_v29 = vpop.f32.mrb[18].mxu1 }
 0x16c   : > { %v1440_v30 = vpack.c.bf16 %v1658_v28, %v1657_v24  ;;  %v1520_v31 = vpack.c.bf16 %v1690_v29, %v1689_v25  ;;  %v601_v32 = vpop.f32.mrb[19].mxu0  ;;  %v729_v33 = vpop.f32.mrb[19].mxu1 }
 0x16d   : > { %v1435_v34 = vpack.c.bf16 %v601_v32, %v598_v26  ;;  %v1515_v35 = vpack.c.bf16 %v729_v33, %v726_v27 }
 0x16e   : > { %1560 = vst [vmem:[%s2167_s15 + $0x48] sm:$0xff] %v1440_v30   ;;  %1576 = vst [vmem:[%s2167_s15 + $0xc8] sm:$0xff] %v1520_v31  }
 0x16f   : > { %1559 = vst [vmem:[%s2167_s15 + $0x40] sm:$0xff] %v1435_v34   ;;  %1575 = vst [vmem:[%s2167_s15 + $0xc0] sm:$0xff] %v1515_v35  }
 0x171   : > { %v1661_v36 = vpop.f32.mrb[20].mxu0  ;;  %v1693_v37 = vpop.f32.mrb[20].mxu1 }
 0x172   : > { %v614_v38 = vpop.f32.mrb[21].mxu0  ;;  %v742_v39 = vpop.f32.mrb[21].mxu1 }
 0x173   : > { %v1662_v40 = vpop.f32.mrb[22].mxu0  ;;  %v1694_v41 = vpop.f32.mrb[22].mxu1 }
 0x174   : > { %v1450_v42 = vpack.c.bf16 %v1662_v40, %v1661_v36  ;;  %v1530_v43 = vpack.c.bf16 %v1694_v41, %v1693_v37  ;;  %v617_v44 = vpop.f32.mrb[23].mxu0  ;;  %v745_v45 = vpop.f32.mrb[23].mxu1 }
 0x175   : > { %v1445_v46 = vpack.c.bf16 %v617_v44, %v614_v38  ;;  %v1525_v47 = vpack.c.bf16 %v745_v45, %v742_v39 }
 0x176   : > { %1562 = vst [vmem:[%s2167_s15 + $0x58] sm:$0xff] %v1450_v42   ;;  %1578 = vst [vmem:[%s2167_s15 + $0xd8] sm:$0xff] %v1530_v43  }
 0x177   : > { %1561 = vst [vmem:[%s2167_s15 + $0x50] sm:$0xff] %v1445_v46   ;;  %1577 = vst [vmem:[%s2167_s15 + $0xd0] sm:$0xff] %v1525_v47  }
 0x179   : > { %v1665_v48 = vpop.f32.mrb[24].mxu0  ;;  %v1697_v49 = vpop.f32.mrb[24].mxu1 }
 0x17a   : > { %v630_v50 = vpop.f32.mrb[25].mxu0  ;;  %v758_v51 = vpop.f32.mrb[25].mxu1 }
 0x17b   : > { %v1666_v52 = vpop.f32.mrb[26].mxu0  ;;  %v1698_v53 = vpop.f32.mrb[26].mxu1 }
 0x17c   : > { %v1460_v54 = vpack.c.bf16 %v1666_v52, %v1665_v48  ;;  %v1540_v55 = vpack.c.bf16 %v1698_v53, %v1697_v49  ;;  %v633_v56 = vpop.f32.mrb[27].mxu0  ;;  %v761_v57 = vpop.f32.mrb[27].mxu1 }
 0x17d   : > { %v1455_v58 = vpack.c.bf16 %v633_v56, %v630_v50  ;;  %v1535_v59 = vpack.c.bf16 %v761_v57, %v758_v51 }
 0x17e   : > { %1564 = vst [vmem:[%s2167_s15 + $0x68] sm:$0xff] %v1460_v54   ;;  %1580 = vst [vmem:[%s2167_s15 + $0xe8] sm:$0xff] %v1540_v55  }
 0x17f   : > { %1563 = vst [vmem:[%s2167_s15 + $0x60] sm:$0xff] %v1455_v58   ;;  %1579 = vst [vmem:[%s2167_s15 + $0xe0] sm:$0xff] %v1535_v59  }
 0x181   : > { %v1669_v60 = vpop.f32.mrb[28].mxu0  ;;  %v1701_v61 = vpop.f32.mrb[28].mxu1 }
 0x182   : > { %v646_v62 = vpop.f32.mrb[29].mxu0  ;;  %v774_v63 = vpop.f32.mrb[29].mxu1 }
 0x183   : > { %v1670_v0 = vpop.f32.mrb[30].mxu0  ;;  %v1702_v1 = vpop.f32.mrb[30].mxu1 }
 0x184   : > { %v1470_v2 = vpack.c.bf16 %v1670_v0, %v1669_v60  ;;  %v1550_v3 = vpack.c.bf16 %v1702_v1, %v1701_v61  ;;  %v649_v4 = vpop.f32.mrb[31].mxu0  ;;  %v777_v5 = vpop.f32.mrb[31].mxu1 }
 0x185   : > { %v1465_v6 = vpack.c.bf16 %v649_v4, %v646_v62  ;;  %v1545_v7 = vpack.c.bf16 %v777_v5, %v774_v63 }
 0x186   : > { %1566 = vst [vmem:[%s2167_s15 + $0x78] sm:$0xff] %v1470_v2   ;;  %1582 = vst [vmem:[%s2167_s15 + $0xf8] sm:$0xff] %v1550_v3  }
 0x187   : > { %1565 = vst [vmem:[%s2167_s15 + $0x70] sm:$0xff] %v1465_v6   ;;  %1581 = vst [vmem:[%s2167_s15 + $0xf0] sm:$0xff] %v1545_v7  }
 0x188   : > { %1891 = shalt.err (!%p1888_p7)
}
 0x189   : > { %s1892_s20 = scalar_lea.hbm %s2202_s22, 4096  ;;  %s1896_s25 = scalar_lea.hbm %s2254_s2, 8192 }
 0x18a   : > { %p1893_p9 = scmp.ne.s32.totalorder %s2202_s22, %s1892_s20  ;;  %p1897_p5 = scmp.lt.u32.totalorder %s2202_s22, %s2254_s2 }
 0x18b   : > { %p1898_p11 = scmp.lt.u32.totalorder %s1896_s25, %s1892_s20  ;;  %p1900_p4 = scmp.lt.u32.totalorder %s1892_s20, %s2202_s22 }
 0x18c   : > { %p1894_p1 = pnand %p1893_p9, %p2066_p12 }
 0x18d   : > { %p1899_p2 = por %p1898_p11, %p1897_p5 }
 0x18e   : > { %p1895_p0 = pneg %p1894_p1 }
 0x18f   : > { %p1901_p6 = por %p1900_p4, %p1899_p2 }
 0x191   : > { %p1902_p8 = pnand %p1901_p6, %p1895_p0 }
 0x193   : > { %1905 = shalt.err (!%p1902_p8)
}
 0x194   : > { %s1955_s30 = smov 64   ;;  %s1956_s23 = smov 4  }
 0x195   : > { %1725 = dma.vmem_to_hbm [thread:$0]  (%p2066_p12), %s2204_s4, 4096, %s2202_s22, %s1110_s13, %s1955_s30, %s1955_s30, %s1956_s23  }
 0x196 PF: > { %s1138_s15 = sand.u32 1, %s1936_s9   ;;  %p2269_p10 = scmp.ne.s32.totalorder %s2259_s16, 0 }
 0x197   : > { %p2270_p13 = scmp.ge.s32.totalorder %s1948_s12, 2  ;;  %s1139_s17 = scalar_lea.sflag [#allocation4], %s1138_s15 }
 0x199   : > { %p1736_p3 = pnand %p2270_p13, %p2269_p10 }
 0x19b   : > { %1931 = dma.done.wait (!%p1736_p3), %s1139_s17, 4096  }
 0x19c   : > { %1933 = vsyncadd (!%p1736_p3), %s1139_s17, 4294963200  ;;  %p16_p7 = scmp.ge.s32.totalorder %s2028_s21, 4   ;;  %s2271_s9 = smov %s1940_s10 }
 0x19d   : > { %s2272_s10 = smov %s1944_s11  ;;  %s2273_s11 = smov %s2062_s8 }
 0x19e   : > { %s2274_s12 = smov %s2028_s21  ;;  %18 = sbr.rel (!%p16_p7) target bundleno = 6 (0x6), region = 77 }
 0x1a5   :  { %1144 = vsyncpa [#allocation3], 1 }
 0x1a6   :  { %1146 = vsyncpa [#allocation3 + $0x1], 1 }
 0x1a7   :  { %1147 = vsyncpa [#allocation6], 1 }
 0x1a8   :  { %1148 = vsyncpa [#allocation4], 1 }
 0x1a9   :  { %1150 = vsyncpa [#allocation4 + $0x1], 1 }

</bundles_post_ra>
